<compile_context>
chip_gen: v5e
topology: v5e:2x2
jax: 0.10.0
libtpu: 0.0.40
codegen_flags: <defaults>
</compile_context>

<pallas_src>
import jax
import jax.numpy as jnp
from jax.experimental import pallas as pl
from jax.experimental.pallas import tpu as pltpu


def _lpe_kernel(a2_ref, pe_ref, b2_ref, out_ref):
    # out = a_2 * pe + b_2, computed in f32, stored in out dtype.
    a = a2_ref[...].astype(jnp.float32)
    p = pe_ref[...].astype(jnp.float32)
    b = b2_ref[...].astype(jnp.float32)
    out_ref[...] = (a * p + b).astype(out_ref.dtype)


def _pick_tile_rows(n_rows, row_bytes):
    """Rows per block: 3 inputs + 1 output, double-buffered ~= 8 live buffers.

    Keep 8 * TS * row_bytes under ~24 MiB so it fits the scoped-VMEM default
    on every generation (16 MiB v5e, 32 MiB v6e/v7x) with headroom.
    """
    budget = 24 * 1024 * 1024
    ts = budget // (8 * max(row_bytes, 1))
    ts = min(ts, 1024)          # diminishing returns past ~1024 rows
    if ts >= n_rows:
        return n_rows           # single full-extent block
    return max(8, (ts // 8) * 8)


def _lpe_pallas(a, p, b, out_rows, out_cols, out_dtype):
    """Elementwise a*p+b over (out_rows, out_cols); operands may have a
    size-1 leading dim (broadcast handled in-kernel)."""
    ts = _pick_tile_rows(out_rows, out_cols * jnp.dtype(out_dtype).itemsize)
    grid = (pl.cdiv(out_rows, ts),)

    def spec_for(arr):
        if arr.shape[0] == out_rows:
            return pl.BlockSpec((ts, out_cols), lambda i: (i, 0))
        # size-1 operand: always fetch block 0, broadcast inside the kernel
        return pl.BlockSpec((1, out_cols), lambda i: (0, 0))

    return pl.pallas_call(
        _lpe_kernel,
        out_shape=jax.ShapeDtypeStruct((out_rows, out_cols), out_dtype),
        grid=grid,
        in_specs=[spec_for(a), spec_for(p), spec_for(b)],
        out_specs=pl.BlockSpec((ts, out_cols), lambda i: (i, 0)),
        compiler_params=pltpu.CompilerParams(
            dimension_semantics=("parallel",)),
    )(a, p, b)


def learned_positional_embedding3(x, pe, a_2, b_2):
    """Forward pass of LearnedPositionalEmbedding3.

    Args:
      x:   (B, L, ...) — only x.shape[1] is used.
      pe:  (1, max_len, d_model)
      a_2: (max_len, d_model)
      b_2: (max_len, d_model)

    Returns:
      (1, S, d_model) with S = max(L, max_len), same as
      a_2 * pe[:, :L] + b_2 in PyTorch.
    """
    L = int(x.shape[1])
    max_len, d_model = a_2.shape
    if not (L == max_len or L == 1 or max_len == 1):
        raise ValueError(
            f"Broadcast error (same as PyTorch): L={L} vs max_len={max_len}")

    out_dtype = jnp.result_type(a_2.dtype, pe.dtype, b_2.dtype)
    pe2 = pe[0, :L, :]                              # (L, d_model)
    S = max(L, max_len)

    if L == max_len:
        # Fast path: all operands share shape (S, d_model), no broadcast.
        a, p, b = a_2, pe2, b_2
        rows, cols = S, d_model
        # Lane-dense folding when d_model is not a multiple of 128.
        if d_model % 128 != 0 and (S * d_model) % 128 == 0:
            rows, cols = (S * d_model) // 128, 128
            a = a.reshape(rows, cols)
            p = p.reshape(rows, cols)
            b = b.reshape(rows, cols)
        out2d = _lpe_pallas(a, p, b, rows, cols, out_dtype)
        return out2d.reshape(1, S, d_model)

    # Broadcast path (L == 1 or max_len == 1): keep the size-1 operand small
    # (no HBM materialization); the kernel broadcasts it across each tile.
    out2d = _lpe_pallas(a_2, pe2, b_2, S, d_model, out_dtype)
    return out2d.reshape(1, S, d_model)


if __name__ == "__main__":
    # Small shapes consistent with the module's forward.
    batch, seq_len, d_model = 2, 8, 32
    max_len = seq_len  # PyTorch broadcasting constraint in the original code

    key = jax.random.PRNGKey(0)
    k_pe, k_x = jax.random.split(key)

    # Deterministic parameter init matching __init__:
    pe = (jax.random.normal(k_pe, (1, max_len, d_model), dtype=jnp.float32)
          * (d_model ** -0.5))
    a_2 = jnp.ones((max_len, d_model), dtype=jnp.float32)
    b_2 = jnp.zeros((max_len, d_model), dtype=jnp.float32)

    # Example input (values unused; only shape[1] matters).
    x = jax.random.normal(k_x, (batch, seq_len, d_model), dtype=jnp.float32)

    out = learned_positional_embedding3(x, pe, a_2, b_2)
    out = jax.block_until_ready(out)

    # Reference check in plain JAX.
    ref = a_2 * pe[:, :seq_len] + b_2
    assert out.shape == (1, seq_len, d_model), out.shape
    assert jnp.allclose(out, ref, atol=1e-6), "mismatch vs reference"

    print("KERNEL_OK")
</pallas_src>

<mosaic_0001>
module attributes {stable_mosaic.version = 11 : i64} {
  func.func @_lpe_kernel(%arg0: i32, %arg1: memref<2x128xf32, #tpu.memory_space<vmem>>, %arg2: memref<2x128xf32, #tpu.memory_space<vmem>>, %arg3: memref<2x128xf32, #tpu.memory_space<vmem>>, %arg4: memref<2x128xf32, #tpu.memory_space<vmem>>) attributes {dimension_semantics = [#tpu.dimension_semantics<parallel>], iteration_bounds = array<i64: 1>, scalar_prefetch = 0 : i64, scratch_operands = 0 : i64, tpu.core_type = #tpu.core_type<tc>, window_params = [{transform_indices = @transform_0, window_bounds = array<i64: 2, 128>}, {transform_indices = @transform_1, window_bounds = array<i64: 2, 128>}, {transform_indices = @transform_2, window_bounds = array<i64: 2, 128>}, {transform_indices = @transform_3, window_bounds = array<i64: 2, 128>}]} {
    %c0 = arith.constant 0 : index
    %c0_0 = arith.constant 0 : index
    %0 = vector.load %arg1[%c0, %c0_0] : memref<2x128xf32, #tpu.memory_space<vmem>>, vector<2x128xf32>
    %c0_1 = arith.constant 0 : index
    %c0_2 = arith.constant 0 : index
    %1 = vector.load %arg2[%c0_1, %c0_2] : memref<2x128xf32, #tpu.memory_space<vmem>>, vector<2x128xf32>
    %c0_3 = arith.constant 0 : index
    %c0_4 = arith.constant 0 : index
    %2 = vector.load %arg3[%c0_3, %c0_4] : memref<2x128xf32, #tpu.memory_space<vmem>>, vector<2x128xf32>
    %3 = arith.mulf %0, %1 : vector<2x128xf32>
    %4 = arith.addf %3, %2 : vector<2x128xf32>
    %c0_5 = arith.constant 0 : index
    %c0_6 = arith.constant 0 : index
    %5 = vector.load %arg4[%c0_5, %c0_6] : memref<2x128xf32, #tpu.memory_space<vmem>>, vector<2x128xf32>
    tpu.vector_store %arg4[%c0_5, %c0_6], %4 {strides = array<i32>} : memref<2x128xf32, #tpu.memory_space<vmem>>, vector<2x128xf32>,
    return
  }
  func.func @transform_0(%arg0: i32) -> (i32, i32) {
    %c0_i32 = arith.constant 0 : i32
    %c0_i32_0 = arith.constant 0 : i32
    return %arg0, %c0_i32 : i32, i32
  }
  func.func @transform_1(%arg0: i32) -> (i32, i32) {
    %c0_i32 = arith.constant 0 : i32
    %c0_i32_0 = arith.constant 0 : i32
    return %arg0, %c0_i32 : i32, i32
  }
  func.func @transform_2(%arg0: i32) -> (i32, i32) {
    %c0_i32 = arith.constant 0 : i32
    %c0_i32_0 = arith.constant 0 : i32
    return %arg0, %c0_i32 : i32, i32
  }
  func.func @transform_3(%arg0: i32) -> (i32, i32) {
    %c0_i32 = arith.constant 0 : i32
    %c0_i32_0 = arith.constant 0 : i32
    return %arg0, %c0_i32 : i32, i32
  }
}

</mosaic_0001>

<bundles_post_ra>
// kernel: tpu_custom_call.1
= control target key start
LH: loop header
LB: loop body
LE: loop exit
PB: predicated region body
PF: predicated region fallthrough
CT: control target
= control target key end

     0   :  { %8 = vsyncpa [#allocation3], 0  ;;  %s222_s0 = inlined_call_operand.hbm [shape: f32[2,128], index: 0, kind: input, shape index: {}]   ;;  %s223_s1 = inlined_call_operand.hbm [shape: f32[2,128], index: 1, kind: input, shape index: {}]   ;;  %s224_s2 = inlined_call_operand.hbm [shape: f32[2,128], index: 2, kind: input, shape index: {}]   ;;  %s225_s3 = inlined_call_operand.hbm [shape: f32[2,128], index: 3, kind: output, shape index: {}]  }
   0x1   :  { %9 = vsyncpa [#allocation6], 0  ;;  %s27_s14 = sshll.u32 %s223_s1, 4  ;;  %s28_s14 = int_to_ptr.hbm [resolvable:$true] %s27_s14 }
   0x2   :  { %10 = vsyncpa [#allocation4], 0  ;;  %s186_s15 = smov [#allocation5]   ;;  %s16_s19 = sshll.u32 %s222_s0, 4  ;;  %s17_s19 = int_to_ptr.hbm [resolvable:$true] %s16_s19 }
   0x3   :  { %s29_s16 = sshll.u32 %s186_s15, 4  ;;  %s187_s20 = smov [#allocation2]   ;;  %s30_s16 = int_to_ptr.vmem [resolvable:$true] %s29_s16 }
   0x4   :  { %32 = dma.hbm_to_vmem [thread:$0]  %s28_s14, 32, %s30_s16, [#allocation6]  }
   0x5   :  { %s18_s21 = sshll.u32 %s187_s20, 4  ;;  %s38_s24 = sshll.u32 %s224_s2, 4  ;;  %s19_s21 = int_to_ptr.vmem [resolvable:$true] %s18_s21  ;;  %s39_s24 = int_to_ptr.hbm [resolvable:$true] %s38_s24 }
   0x6   :  { %21 = dma.hbm_to_vmem [thread:$0]  %s17_s19, 32, %s19_s21, [#allocation3]  }
   0x7   :  { %s188_s1 = smov [#allocation7]  }
   0x8   :  { %s40_s25 = sshll.u32 %s188_s1, 4  ;;  %s41_s25 = int_to_ptr.vmem [resolvable:$true] %s40_s25 }
   0x9   :  { %43 = dma.hbm_to_vmem [thread:$0]  %s39_s24, 32, %s41_s25, [#allocation6]  }
   0xa   :  { %180 = dma.done.wait [#allocation3], 32  }
   0xb   :  { %181 = vsyncadd [#allocation3], 4294967264 }
   0xc   :  { %182 = dma.done.wait [#allocation6], 64  }
   0xd   :  { %183 = vsyncadd [#allocation6], 4294967232  ;;  %s189_s0 = smov [#allocation8]   ;;  %s69_s29 = sshll.u32 %s225_s3, 4  ;;  %v56_v0 = vld [vmem:[#allocation2] sm:$0x3]  ;;  %s70_s29 = int_to_ptr.hbm [resolvable:$true] %s69_s29 }
   0xe   :  { %s67_s26 = sshll.u32 %s189_s0, 4  ;;  %v57_v1 = vld [vmem:[#allocation5] sm:$0x3]  ;;  %v58_v2 = vld [vmem:[#allocation7] sm:$0x3]  ;;  %s68_s26 = int_to_ptr.vmem [resolvable:$true] %s67_s26 }
   0xf   :  { %v59_v3 = vmul.f32 %v57_v1, %v56_v0 }
  0x11   :  { %v60_v4 = vadd.f32 %v59_v3, %v58_v2 }
  0x13   :  { %61 = vst [vmem:[#allocation8] sm:$0x3] %v60_v4 }
  0x14   :  { %72 = dma.vmem_to_hbm [thread:$0]  %s68_s26, 32, %s70_s29, [#allocation4]  }
  0x15   :  { %184 = dma.done.wait [#allocation4], 32  }
  0x16   :  { %185 = vsyncadd [#allocation4], 4294967264 }
  0x17   :  { %77 = vsyncpa [#allocation3], 1 }
  0x18   :  { %78 = vsyncpa [#allocation6], 1 }
  0x19   :  { %79 = vsyncpa [#allocation4], 1 }

</bundles_post_ra>
